<compile_context>
chip_gen: v5e
topology: v5e:2x2
jax: 0.10.0
libtpu: 0.0.40
codegen_flags: <defaults>
</compile_context>

<pallas_src>
import numpy as np
import jax
import jax.numpy as jnp
from jax import lax
from jax.experimental import pallas as pl
from jax.experimental.pallas import tpu as pltpu

# ---- module hyper-parameters (mirroring server.py) ----
N_LAYERS = 2
N_QUBITS = 4
DIM = 2 ** N_QUBITS        # 16 statevector amplitudes
HIDDEN = 16                # feature_reducer hidden width
NUM_CLASSES = 3


def _round_up(a: int, m: int) -> int:
    return -(-a // m) * m


# ---------------------------------------------------------------------------
# Host-side glue: constant 16x16 unitary for the fixed (weight) part of the
# circuit.  PennyLane default.qubit convention: wire 0 is the most significant bit.
# ---------------------------------------------------------------------------
def _build_circuit_unitary(qweights: np.ndarray) -> np.ndarray:
    n, dim = N_QUBITS, DIM
    I2 = np.eye(2, dtype=np.complex128)

    def embed(gate, wire):
        mats = [I2] * n
        mats[wire] = gate
        full = mats[0]
        for m in mats[1:]:
            full = np.kron(full, m)
        return full

    def ry(t):
        c, s = np.cos(t / 2.0), np.sin(t / 2.0)
        return np.array([[c, -s], [s, c]], dtype=np.complex128)

    def rz(p):
        return np.array([[np.exp(-1j * p / 2.0), 0.0],
                         [0.0, np.exp(1j * p / 2.0)]], dtype=np.complex128)

    def cnot(c_wire, t_wire):
        M = np.zeros((dim, dim), dtype=np.complex128)
        for k in range(dim):
            if (k >> (n - 1 - c_wire)) & 1:
                j = k ^ (1 << (n - 1 - t_wire))
            else:
                j = k
            M[j, k] = 1.0
        return M

    U = np.eye(dim, dtype=np.complex128)
    for l in range(N_LAYERS):
        for i in range(n):
            U = embed(rz(qweights[l, i, 0]), i) @ U
            U = embed(ry(qweights[l, i, 1]), i) @ U
        for i in range(n - 1):
            U = cnot(i, i + 1) @ U
        U = cnot(n - 1, 0) @ U
    return U


def _zsign_table() -> np.ndarray:
    # zsign[idx, i] = +1/-1 eigenvalue of Z_i for basis state idx (wire 0 = MSB)
    zs = np.zeros((DIM, N_QUBITS), dtype=np.float32)
    for idx in range(DIM):
        for i in range(N_QUBITS):
            bit = (idx >> (N_QUBITS - 1 - i)) & 1
            zs[idx, i] = 1.0 - 2.0 * bit
    return zs


# ---------------------------------------------------------------------------
# Pallas kernel: one batch tile per grid step, everything resident in VMEM.
# ---------------------------------------------------------------------------
def _make_hybrid_kernel(feature_size: int):
    F = feature_size

    def hybrid_kernel(x_ref, wb_ref, w1_ref, w2_ref, ucat_ref, zwc_ref,
                      bias_ref, out_ref):
        # one unmasked (4, 128) load of the lane-padded packed biases, sliced in-register
        bias = bias_ref[...]                                         # (4, 128) f32
        bb = bias[0:1, 0:F]
        b1 = bias[1:2, 0:HIDDEN]
        b2 = bias[2:3, 0:N_QUBITS]
        bc = bias[3:4, 0:NUM_CLASSES]

        # backbone: Linear + ReLU.  x streamed from HBM as f32; cast to bf16 here so the
        # MXU matmul runs bf16 x bf16 -> f32 with no extra wrapper-side pass over x.
        x = x_ref[...].astype(jnp.bfloat16)                          # (TB, in_dim)
        feat = jnp.dot(x, wb_ref[...], preferred_element_type=jnp.float32) + bb
        feat = jnp.maximum(feat, 0.0)                                # (TB, F) f32

        # feature_reducer: Linear(F,16) -> ReLU -> Linear(16,4)
        h = jnp.dot(feat, w1_ref[...], preferred_element_type=jnp.float32) + b1
        h = jnp.maximum(h, 0.0)                                      # (TB, 16)
        ang = jnp.dot(h, w2_ref[...], preferred_element_type=jnp.float32) + b2  # (TB,4)

        # quantum layer: RY encoding of |0..0> -> real product state psi0 (TB, 16)
        half = 0.5 * ang
        c = jnp.cos(half)                                            # (TB, 4)
        s = jnp.sin(half)

        # bit masks hoisted above the product loop (built once per grid step)
        idx = lax.broadcasted_iota(jnp.int32, (1, DIM), 1)           # basis indices
        bits = [((idx >> (N_QUBITS - 1 - i)) & 1).astype(jnp.float32)
                for i in range(N_QUBITS)]                            # 4 x (1, 16)
        nbits = [1.0 - b for b in bits]

        psi0 = jnp.ones((x_ref.shape[0], DIM), dtype=jnp.float32)
        for i in range(N_QUBITS):                                    # static 4-way unroll
            psi0 = psi0 * (c[:, i:i + 1] * nbits[i] + s[:, i:i + 1] * bits[i])

        # fixed unitary: psi = psi0 @ [Re(U^T) | Im(U^T)]  -> one (16,32) matmul
        psi = jnp.dot(psi0, ucat_ref[...], preferred_element_type=jnp.float32)  # (TB,32)
        pr = psi[:, :DIM]
        pi = psi[:, DIM:]
        prob = pr * pr + pi * pi                                     # |amplitude|^2

        # fused <Z_i> + classifier: prob @ (zsign @ wc) + bc
        out_ref[...] = jnp.dot(prob, zwc_ref[...],
                               preferred_element_type=jnp.float32) + bc

    return hybrid_kernel


# ---------------------------------------------------------------------------
# Wrapper
# ---------------------------------------------------------------------------
def base_hybrid_forward(x, params, *, tb: int = 256):
    B = x.shape[0]
    in_dim = int(np.prod(x.shape[1:]))
    F = params["wb"].shape[1]
    bias_w = params["bias"].shape[1]

    # flatten NCHW row-major; stays f32 in HBM (no wrapper-side cast / pad passes)
    x_flat = x.reshape(B, in_dim)

    # --- batch-tile selection ---
    tb = _round_up(max(8, min(tb, _round_up(B, 8))), 8)
    # v7x megacore: keep >= 2 parallel grid steps whenever the batch allows it
    if pl.cdiv(B, tb) < 2 and B > 8:
        tb = _round_up(pl.cdiv(B, 2), 8)
    # keep the double-buffered f32 x tile well under VMEM limits on all generations
    X_TILE_BUDGET = 16 * 1024 * 1024
    while tb > 8 and 2 * tb * in_dim * 4 > X_TILE_BUDGET:
        tb = _round_up(tb // 2, 8)

    nsteps = pl.cdiv(B, tb)
    grid = (nsteps,)

    in_specs = [
        pl.BlockSpec((tb, in_dim), lambda i: (i, 0)),                # x (batch-tiled, f32)
        pl.BlockSpec((in_dim, F), lambda i: (0, 0)),                 # wb (bf16)
        pl.BlockSpec((F, HIDDEN), lambda i: (0, 0)),                 # w1
        pl.BlockSpec((HIDDEN, N_QUBITS), lambda i: (0, 0)),          # w2
        pl.BlockSpec((DIM, 2 * DIM), lambda i: (0, 0)),              # [Re U^T | Im U^T]
        pl.BlockSpec((DIM, NUM_CLASSES), lambda i: (0, 0)),          # zsign @ wc
        pl.BlockSpec((4, bias_w), lambda i: (0, 0)),                 # packed biases (4,128)
    ]
    out_spec = pl.BlockSpec((tb, NUM_CLASSES), lambda i: (i, 0))

    rows = nsteps * tb
    flops = 2 * rows * (in_dim * F + F * HIDDEN + HIDDEN * N_QUBITS
                        + DIM * 2 * DIM + DIM * NUM_CLASSES)
    transcendentals = rows * 2 * N_QUBITS                            # cos + sin per angle
    bytes_accessed = (rows * in_dim * 4 + in_dim * F * 2
                      + F * HIDDEN * 4 + HIDDEN * N_QUBITS * 4
                      + DIM * 2 * DIM * 4 + DIM * NUM_CLASSES * 4
                      + 4 * bias_w * 4 + rows * NUM_CLASSES * 4)

    out = pl.pallas_call(
        _make_hybrid_kernel(F),
        out_shape=jax.ShapeDtypeStruct((B, NUM_CLASSES), jnp.float32),
        grid=grid,
        in_specs=in_specs,
        out_specs=out_spec,
        compiler_params=pltpu.CompilerParams(
            dimension_semantics=("parallel",),
            vmem_limit_bytes=32 * 1024 * 1024),
        cost_estimate=pl.CostEstimate(
            flops=int(flops),
            transcendentals=int(transcendentals),
            bytes_accessed=int(bytes_accessed)),
    )(x_flat, params["wb"], params["w1"], params["w2"],
      params["ucat"], params["zwc"], params["bias"])

    return out


# ---------------------------------------------------------------------------
# Parameter construction (host-side; mirrors PyTorch init shapes)
# ---------------------------------------------------------------------------
def make_params(key, in_dim, feature_size):
    ks = jax.random.split(key, 8)
    scale = 0.1
    F = feature_size
    wb = scale * jax.random.normal(ks[0], (in_dim, F), jnp.float32)
    bb = scale * jax.random.normal(ks[1], (1, F), jnp.float32)
    w1 = scale * jax.random.normal(ks[2], (F, HIDDEN), jnp.float32)
    b1 = scale * jax.random.normal(ks[3], (1, HIDDEN), jnp.float32)
    w2 = scale * jax.random.normal(ks[4], (HIDDEN, N_QUBITS), jnp.float32)
    b2 = scale * jax.random.normal(ks[5], (1, N_QUBITS), jnp.float32)
    wc = scale * jax.random.normal(ks[6], (N_QUBITS, NUM_CLASSES), jnp.float32)
    bc = scale * jax.random.normal(ks[7], (1, NUM_CLASSES), jnp.float32)

    # TorchLayer default init for 'weights': uniform in [0, 2*pi)
    qw = np.asarray(
        jax.random.uniform(jax.random.PRNGKey(42), (N_LAYERS, N_QUBITS, 2),
                           jnp.float32, 0.0, 2.0 * np.pi),
        dtype=np.float64,
    )
    U = _build_circuit_unitary(qw)
    zsign = _zsign_table()                                           # (16, 4)

    # fused operands
    ucat = np.concatenate([U.T.real, U.T.imag], axis=1).astype(np.float32)  # (16, 32)
    zwc = (zsign @ np.asarray(wc, dtype=np.float32)).astype(np.float32)     # (16, 3)

    # packed biases, lane-padded to a multiple of 128 so the kernel does one unmasked load
    bias_w = _round_up(max(F, HIDDEN, N_QUBITS, NUM_CLASSES), 128)
    bias = np.zeros((4, bias_w), dtype=np.float32)
    bias[0, :F] = np.asarray(bb)[0]
    bias[1, :HIDDEN] = np.asarray(b1)[0]
    bias[2, :N_QUBITS] = np.asarray(b2)[0]
    bias[3, :NUM_CLASSES] = np.asarray(bc)[0]

    return dict(
        wb=wb.astype(jnp.bfloat16),          # bf16 MXU operand for the big matmul
        w1=w1,
        w2=w2,
        ucat=jnp.asarray(ucat),
        zwc=jnp.asarray(zwc),
        bias=jnp.asarray(bias),
    )


if __name__ == "__main__":
    B, C, H, W = 2, 4, 16, 16            # NCHW, like the PyTorch module
    FEATURE_SIZE = 32
    in_dim = C * H * W

    key = jax.random.PRNGKey(0)
    kx, kp = jax.random.split(key)
    x = jax.random.normal(kx, (B, C, H, W), jnp.float32)
    params = make_params(kp, in_dim, FEATURE_SIZE)

    out = base_hybrid_forward(x, params)
    out = jax.block_until_ready(out)
    assert out.shape == (B, NUM_CLASSES)
    print("KERNEL_OK")
</pallas_src>

<mosaic_0001>
module attributes {stable_mosaic.version = 11 : i64} {
  func.func @hybrid_kernel(%arg0: i32, %arg1: memref<8x1024xf32, #tpu.memory_space<vmem>>, %arg2: memref<1024x32xbf16, #tpu.memory_space<vmem>>, %arg3: memref<32x16xf32, #tpu.memory_space<vmem>>, %arg4: memref<16x4xf32, #tpu.memory_space<vmem>>, %arg5: memref<16x32xf32, #tpu.memory_space<vmem>>, %arg6: memref<16x3xf32, #tpu.memory_space<vmem>>, %arg7: memref<4x128xf32, #tpu.memory_space<vmem>>, %arg8: memref<8x3xf32, #tpu.memory_space<vmem>>) attributes {dimension_semantics = [#tpu.dimension_semantics<parallel>], iteration_bounds = array<i64: 1>, scalar_prefetch = 0 : i64, scratch_operands = 0 : i64, tpu.core_type = #tpu.core_type<tc>, window_params = [{transform_indices = @transform_0, window_bounds = array<i64: 8, 1024>}, {pipeline_mode = #tpu.pipeline_mode<synchronous>, transform_indices = @transform_1, window_bounds = array<i64: 1024, 32>}, {pipeline_mode = #tpu.pipeline_mode<synchronous>, transform_indices = @transform_2, window_bounds = array<i64: 32, 16>}, {pipeline_mode = #tpu.pipeline_mode<synchronous>, transform_indices = @transform_3, window_bounds = array<i64: 16, 4>}, {pipeline_mode = #tpu.pipeline_mode<synchronous>, transform_indices = @transform_4, window_bounds = array<i64: 16, 32>}, {pipeline_mode = #tpu.pipeline_mode<synchronous>, transform_indices = @transform_5, window_bounds = array<i64: 16, 3>}, {pipeline_mode = #tpu.pipeline_mode<synchronous>, transform_indices = @transform_6, window_bounds = array<i64: 4, 128>}, {transform_indices = @transform_7, window_bounds = array<i64: 8, 3>}]} {
    %c0 = arith.constant 0 : index
    %c0_0 = arith.constant 0 : index
    %0 = vector.load %arg7[%c0, %c0_0] : memref<4x128xf32, #tpu.memory_space<vmem>>, vector<4x128xf32>
    %1 = vector.extract_strided_slice %0 {offsets = [0, 0], sizes = [1, 32], strides = [1, 1]} : vector<4x128xf32> to vector<1x32xf32>
    %2 = vector.extract_strided_slice %0 {offsets = [1, 0], sizes = [1, 16], strides = [1, 1]} : vector<4x128xf32> to vector<1x16xf32>
    %3 = vector.extract_strided_slice %0 {offsets = [2, 0], sizes = [1, 4], strides = [1, 1]} : vector<4x128xf32> to vector<1x4xf32>
    %4 = vector.extract_strided_slice %0 {offsets = [3, 0], sizes = [1, 3], strides = [1, 1]} : vector<4x128xf32> to vector<1x3xf32>
    %c0_1 = arith.constant 0 : index
    %c0_2 = arith.constant 0 : index
    %5 = vector.load %arg1[%c0_1, %c0_2] : memref<8x1024xf32, #tpu.memory_space<vmem>>, vector<8x1024xf32>
    %6 = arith.truncf %5 : vector<8x1024xf32> to vector<8x1024xbf16>
    %c0_3 = arith.constant 0 : index
    %c0_4 = arith.constant 0 : index
    %7 = vector.load %arg2[%c0_3, %c0_4] : memref<1024x32xbf16, #tpu.memory_space<vmem>>, vector<1024x32xbf16>
    %cst = arith.constant dense<0.000000e+00> : vector<8x32xf32>
    %8 = tpu.matmul %6, %7, %cst {dimension_numbers = #tpu.dot_dimension_numbers<[1], [0], [0], [1], [0, 0, 1, 1], [], []>} : vector<8x1024xbf16>, vector<1024x32xbf16>, vector<8x32xf32> -> vector<8x32xf32>
    %9 = vector.broadcast %1 : vector<1x32xf32> to vector<8x32xf32>
    %10 = arith.addf %8, %9 : vector<8x32xf32>
    %cst_5 = arith.constant 0.000000e+00 : f32
    %11 = vector.broadcast %cst_5 : f32 to vector<8x32xf32>
    %12 = arith.maximumf %10, %11 : vector<8x32xf32>
    %c0_6 = arith.constant 0 : index
    %c0_7 = arith.constant 0 : index
    %13 = vector.load %arg3[%c0_6, %c0_7] : memref<32x16xf32, #tpu.memory_space<vmem>>, vector<32x16xf32>
    %cst_8 = arith.constant dense<0.000000e+00> : vector<8x16xf32>
    %14 = tpu.matmul %12, %13, %cst_8 {dimension_numbers = #tpu.dot_dimension_numbers<[1], [0], [0], [1], [0, 0, 1, 1], [], []>} : vector<8x32xf32>, vector<32x16xf32>, vector<8x16xf32> -> vector<8x16xf32>
    %15 = vector.broadcast %2 : vector<1x16xf32> to vector<8x16xf32>
    %16 = arith.addf %14, %15 : vector<8x16xf32>
    %cst_9 = arith.constant 0.000000e+00 : f32
    %17 = vector.broadcast %cst_9 : f32 to vector<8x16xf32>
    %18 = arith.maximumf %16, %17 : vector<8x16xf32>
    %c0_10 = arith.constant 0 : index
    %c0_11 = arith.constant 0 : index
    %19 = vector.load %arg4[%c0_10, %c0_11] : memref<16x4xf32, #tpu.memory_space<vmem>>, vector<16x4xf32>
    %cst_12 = arith.constant dense<0.000000e+00> : vector<8x4xf32>
    %20 = tpu.matmul %18, %19, %cst_12 {dimension_numbers = #tpu.dot_dimension_numbers<[1], [0], [0], [1], [0, 0, 1, 1], [], []>} : vector<8x16xf32>, vector<16x4xf32>, vector<8x4xf32> -> vector<8x4xf32>
    %21 = vector.broadcast %3 : vector<1x4xf32> to vector<8x4xf32>
    %22 = arith.addf %20, %21 : vector<8x4xf32>
    %cst_13 = arith.constant 5.000000e-01 : f32
    %23 = vector.broadcast %cst_13 : f32 to vector<8x4xf32>
    %24 = arith.mulf %23, %22 : vector<8x4xf32>
    %25 = math.cos %24 : vector<8x4xf32>
    %26 = math.sin %24 : vector<8x4xf32>
    %27 = tpu.iota {dimensions = array<i32: 1>} : vector<1x16xi32>
    %c3_i32 = arith.constant 3 : i32
    %28 = vector.broadcast %c3_i32 : i32 to vector<1x16xi32>
    %29 = arith.shrsi %27, %28 : vector<1x16xi32>
    %c1_i32 = arith.constant 1 : i32
    %30 = vector.broadcast %c1_i32 : i32 to vector<1x16xi32>
    %31 = arith.andi %29, %30 : vector<1x16xi32>
    %32 = arith.sitofp %31 : vector<1x16xi32> to vector<1x16xf32>
    %c2_i32 = arith.constant 2 : i32
    %33 = vector.broadcast %c2_i32 : i32 to vector<1x16xi32>
    %34 = arith.shrsi %27, %33 : vector<1x16xi32>
    %c1_i32_14 = arith.constant 1 : i32
    %35 = vector.broadcast %c1_i32_14 : i32 to vector<1x16xi32>
    %36 = arith.andi %34, %35 : vector<1x16xi32>
    %37 = arith.sitofp %36 : vector<1x16xi32> to vector<1x16xf32>
    %c1_i32_15 = arith.constant 1 : i32
    %38 = vector.broadcast %c1_i32_15 : i32 to vector<1x16xi32>
    %39 = arith.shrsi %27, %38 : vector<1x16xi32>
    %c1_i32_16 = arith.constant 1 : i32
    %40 = vector.broadcast %c1_i32_16 : i32 to vector<1x16xi32>
    %41 = arith.andi %39, %40 : vector<1x16xi32>
    %42 = arith.sitofp %41 : vector<1x16xi32> to vector<1x16xf32>
    %c0_i32 = arith.constant 0 : i32
    %43 = vector.broadcast %c0_i32 : i32 to vector<1x16xi32>
    %44 = arith.shrsi %27, %43 : vector<1x16xi32>
    %c1_i32_17 = arith.constant 1 : i32
    %45 = vector.broadcast %c1_i32_17 : i32 to vector<1x16xi32>
    %46 = arith.andi %44, %45 : vector<1x16xi32>
    %47 = arith.sitofp %46 : vector<1x16xi32> to vector<1x16xf32>
    %cst_18 = arith.constant 1.000000e+00 : f32
    %48 = vector.broadcast %cst_18 : f32 to vector<1x16xf32>
    %49 = arith.subf %48, %32 : vector<1x16xf32>
    %cst_19 = arith.constant 1.000000e+00 : f32
    %50 = vector.broadcast %cst_19 : f32 to vector<1x16xf32>
    %51 = arith.subf %50, %37 : vector<1x16xf32>
    %cst_20 = arith.constant 1.000000e+00 : f32
    %52 = vector.broadcast %cst_20 : f32 to vector<1x16xf32>
    %53 = arith.subf %52, %42 : vector<1x16xf32>
    %cst_21 = arith.constant 1.000000e+00 : f32
    %54 = vector.broadcast %cst_21 : f32 to vector<1x16xf32>
    %55 = arith.subf %54, %47 : vector<1x16xf32>
    %cst_22 = arith.constant 1.000000e+00 : f32
    %56 = vector.broadcast %cst_22 : f32 to vector<8x16xf32>
    %57 = vector.extract_strided_slice %25 {offsets = [0, 0], sizes = [8, 1], strides = [1, 1]} : vector<8x4xf32> to vector<8x1xf32>
    %58 = vector.broadcast %57 : vector<8x1xf32> to vector<8x16xf32>
    %59 = vector.broadcast %49 : vector<1x16xf32> to vector<8x16xf32>
    %60 = arith.mulf %58, %59 : vector<8x16xf32>
    %61 = vector.extract_strided_slice %26 {offsets = [0, 0], sizes = [8, 1], strides = [1, 1]} : vector<8x4xf32> to vector<8x1xf32>
    %62 = vector.broadcast %61 : vector<8x1xf32> to vector<8x16xf32>
    %63 = vector.broadcast %32 : vector<1x16xf32> to vector<8x16xf32>
    %64 = arith.mulf %62, %63 : vector<8x16xf32>
    %65 = arith.addf %60, %64 : vector<8x16xf32>
    %66 = arith.mulf %56, %65 : vector<8x16xf32>
    %67 = vector.extract_strided_slice %25 {offsets = [0, 1], sizes = [8, 1], strides = [1, 1]} : vector<8x4xf32> to vector<8x1xf32>
    %68 = vector.broadcast %67 : vector<8x1xf32> to vector<8x16xf32>
    %69 = vector.broadcast %51 : vector<1x16xf32> to vector<8x16xf32>
    %70 = arith.mulf %68, %69 : vector<8x16xf32>
    %71 = vector.extract_strided_slice %26 {offsets = [0, 1], sizes = [8, 1], strides = [1, 1]} : vector<8x4xf32> to vector<8x1xf32>
    %72 = vector.broadcast %71 : vector<8x1xf32> to vector<8x16xf32>
    %73 = vector.broadcast %37 : vector<1x16xf32> to vector<8x16xf32>
    %74 = arith.mulf %72, %73 : vector<8x16xf32>
    %75 = arith.addf %70, %74 : vector<8x16xf32>
    %76 = arith.mulf %66, %75 : vector<8x16xf32>
    %77 = vector.extract_strided_slice %25 {offsets = [0, 2], sizes = [8, 1], strides = [1, 1]} : vector<8x4xf32> to vector<8x1xf32>
    %78 = vector.broadcast %77 : vector<8x1xf32> to vector<8x16xf32>
    %79 = vector.broadcast %53 : vector<1x16xf32> to vector<8x16xf32>
    %80 = arith.mulf %78, %79 : vector<8x16xf32>
    %81 = vector.extract_strided_slice %26 {offsets = [0, 2], sizes = [8, 1], strides = [1, 1]} : vector<8x4xf32> to vector<8x1xf32>
    %82 = vector.broadcast %81 : vector<8x1xf32> to vector<8x16xf32>
    %83 = vector.broadcast %42 : vector<1x16xf32> to vector<8x16xf32>
    %84 = arith.mulf %82, %83 : vector<8x16xf32>
    %85 = arith.addf %80, %84 : vector<8x16xf32>
    %86 = arith.mulf %76, %85 : vector<8x16xf32>
    %87 = vector.extract_strided_slice %25 {offsets = [0, 3], sizes = [8, 1], strides = [1, 1]} : vector<8x4xf32> to vector<8x1xf32>
    %88 = vector.broadcast %87 : vector<8x1xf32> to vector<8x16xf32>
    %89 = vector.broadcast %55 : vector<1x16xf32> to vector<8x16xf32>
    %90 = arith.mulf %88, %89 : vector<8x16xf32>
    %91 = vector.extract_strided_slice %26 {offsets = [0, 3], sizes = [8, 1], strides = [1, 1]} : vector<8x4xf32> to vector<8x1xf32>
    %92 = vector.broadcast %91 : vector<8x1xf32> to vector<8x16xf32>
    %93 = vector.broadcast %47 : vector<1x16xf32> to vector<8x16xf32>
    %94 = arith.mulf %92, %93 : vector<8x16xf32>
    %95 = arith.addf %90, %94 : vector<8x16xf32>
    %96 = arith.mulf %86, %95 : vector<8x16xf32>
    %c0_23 = arith.constant 0 : index
    %c0_24 = arith.constant 0 : index
    %97 = vector.load %arg5[%c0_23, %c0_24] : memref<16x32xf32, #tpu.memory_space<vmem>>, vector<16x32xf32>
    %cst_25 = arith.constant dense<0.000000e+00> : vector<8x32xf32>
    %98 = tpu.matmul %96, %97, %cst_25 {dimension_numbers = #tpu.dot_dimension_numbers<[1], [0], [0], [1], [0, 0, 1, 1], [], []>} : vector<8x16xf32>, vector<16x32xf32>, vector<8x32xf32> -> vector<8x32xf32>
    %99 = vector.extract_strided_slice %98 {offsets = [0, 0], sizes = [8, 16], strides = [1, 1]} : vector<8x32xf32> to vector<8x16xf32>
    %100 = vector.extract_strided_slice %98 {offsets = [0, 16], sizes = [8, 16], strides = [1, 1]} : vector<8x32xf32> to vector<8x16xf32>
    %101 = arith.mulf %99, %99 : vector<8x16xf32>
    %102 = arith.mulf %100, %100 : vector<8x16xf32>
    %103 = arith.addf %101, %102 : vector<8x16xf32>
    %c0_26 = arith.constant 0 : index
    %c0_27 = arith.constant 0 : index
    %104 = vector.load %arg6[%c0_26, %c0_27] : memref<16x3xf32, #tpu.memory_space<vmem>>, vector<16x3xf32>
    %cst_28 = arith.constant dense<0.000000e+00> : vector<8x3xf32>
    %105 = tpu.matmul %103, %104, %cst_28 {dimension_numbers = #tpu.dot_dimension_numbers<[1], [0], [0], [1], [0, 0, 1, 1], [], []>} : vector<8x16xf32>, vector<16x3xf32>, vector<8x3xf32> -> vector<8x3xf32>
    %106 = vector.broadcast %4 : vector<1x3xf32> to vector<8x3xf32>
    %107 = arith.addf %105, %106 : vector<8x3xf32>
    %c0_29 = arith.constant 0 : index
    %c0_30 = arith.constant 0 : index
    %108 = vector.load %arg8[%c0_29, %c0_30] : memref<8x3xf32, #tpu.memory_space<vmem>>, vector<8x3xf32>
    tpu.vector_store %arg8[%c0_29, %c0_30], %107 {strides = array<i32>} : memref<8x3xf32, #tpu.memory_space<vmem>>, vector<8x3xf32>,
    return
  }
  func.func @transform_0(%arg0: i32) -> (i32, i32) {
    %c0_i32 = arith.constant 0 : i32
    %c0_i32_0 = arith.constant 0 : i32
    return %arg0, %c0_i32 : i32, i32
  }
  func.func @transform_1(%arg0: i32) -> (i32, i32) {
    %c0_i32 = arith.constant 0 : i32
    %c0_i32_0 = arith.constant 0 : i32
    %c0_i32_1 = arith.constant 0 : i32
    return %c0_i32, %c0_i32_0 : i32, i32
  }
  func.func @transform_2(%arg0: i32) -> (i32, i32) {
    %c0_i32 = arith.constant 0 : i32
    %c0_i32_0 = arith.constant 0 : i32
    %c0_i32_1 = arith.constant 0 : i32
    return %c0_i32, %c0_i32_0 : i32, i32
  }
  func.func @transform_3(%arg0: i32) -> (i32, i32) {
    %c0_i32 = arith.constant 0 : i32
    %c0_i32_0 = arith.constant 0 : i32
    %c0_i32_1 = arith.constant 0 : i32
    return %c0_i32, %c0_i32_0 : i32, i32
  }
  func.func @transform_4(%arg0: i32) -> (i32, i32) {
    %c0_i32 = arith.constant 0 : i32
    %c0_i32_0 = arith.constant 0 : i32
    %c0_i32_1 = arith.constant 0 : i32
    return %c0_i32, %c0_i32_0 : i32, i32
  }
  func.func @transform_5(%arg0: i32) -> (i32, i32) {
    %c0_i32 = arith.constant 0 : i32
    %c0_i32_0 = arith.constant 0 : i32
    %c0_i32_1 = arith.constant 0 : i32
    return %c0_i32, %c0_i32_0 : i32, i32
  }
  func.func @transform_6(%arg0: i32) -> (i32, i32) {
    %c0_i32 = arith.constant 0 : i32
    %c0_i32_0 = arith.constant 0 : i32
    %c0_i32_1 = arith.constant 0 : i32
    return %c0_i32, %c0_i32_0 : i32, i32
  }
  func.func @transform_7(%arg0: i32) -> (i32, i32) {
    %c0_i32 = arith.constant 0 : i32
    %c0_i32_0 = arith.constant 0 : i32
    return %arg0, %c0_i32 : i32, i32
  }
}

</mosaic_0001>

<bundles_post_ra>
// kernel: tpu_custom_call.1
= control target key start
LH: loop header
LB: loop body
LE: loop exit
PB: predicated region body
PF: predicated region fallthrough
CT: control target
= control target key end

     0   :  { %12 = vsyncpa [#allocation3], 0  ;;  %vm706_vm0 = vcmask 261120   ;;  %vm734_vm1 = vcmask 130048   ;;  %s1596_s20 = smov 112   ;;  %s1962_s0 = inlined_call_operand.vmem [shape: f32[2,1024], index: 0, kind: input, shape index: {}]   ;;  %s1963_s1 = inlined_call_operand.vmem [shape: bf16[1024,32], index: 1, kind: input, shape index: {}]   ;;  %s1964_s2 = inlined_call_operand.vmem [shape: f32[32,16], index: 2, kind: input, shape index: {}]   ;;  %s1965_s3 = inlined_call_operand.vmem [shape: f32[16,4], index: 3, kind: input, shape index: {}]   ;;  %s1966_s4 = inlined_call_operand.vmem [shape: f32[16,32], index: 4, kind: input, shape index: {}]   ;;  %s1967_s5 = inlined_call_operand.vmem [shape: f32[16,3], index: 5, kind: input, shape index: {}]   ;;  %s1968_s6 = inlined_call_operand.vmem [shape: f32[4,128], index: 6, kind: input, shape index: {}]   ;;  %s1969_s7 = inlined_call_operand.hbm [shape: f32[2,3], index: 7, kind: output, shape index: {}]  }
   0x1   :  { %v1484_v0 = vld [vmem:[%s1963_s1 + $0x38] sm:$0xff]  ;;  %v1483_v4 = vld [vmem:[%s1963_s1 + $0x30] sm:$0xff]  ;;  %v1482_v8 = vld [vmem:[%s1963_s1 + $0x28] sm:$0xff] }
   0x2   :  { %v1492_v1 = vld [vmem:[%s1963_s1 + $0x78] sm:$0xff]  ;;  %596 = vmatpush.bf16.msra.mxu0 %v1484_v0  ;;  %v1491_v5 = vld [vmem:[%s1963_s1 + $0x70] sm:$0xff]  ;;  %v1490_v9 = vld [vmem:[%s1963_s1 + $0x68] sm:$0xff] }
   0x3   :  { %v1500_v2 = vld [vmem:[%s1963_s1 + $0xb8] sm:$0xff]  ;;  %609 = vmatpush.bf16.msra.mxu1 %v1492_v1  ;;  %v1499_v6 = vld [vmem:[%s1963_s1 + $0xb0] sm:$0xff]  ;;  %v1498_v10 = vld [vmem:[%s1963_s1 + $0xa8] sm:$0xff] }
   0x4   :  { %v1508_v3 = vld [vmem:[%s1963_s1 + $0xf8] sm:$0xff]  ;;  %622 = vmatpush.bf16.msra.mxu2 %v1500_v2  ;;  %v1507_v7 = vld [vmem:[%s1963_s1 + $0xf0] sm:$0xff]  ;;  %v1506_v11 = vld [vmem:[%s1963_s1 + $0xe8] sm:$0xff] }
   0x5   :  { %635 = vmatpush.bf16.msra.mxu3 %v1508_v3  ;;  %v1481_v12 = vld [vmem:[%s1963_s1 + $0x20] sm:$0xff]  ;;  %v1480_v16 = vld [vmem:[%s1963_s1 + $0x18] sm:$0xff]  ;;  %v30_v19 = vld [vmem:[%s1962_s0 + $0x10] sm:$0xff] }
   0x6   :  { %597 = vmatpush.bf16.msra.mxu0 %v1483_v4  ;;  %v1489_v13 = vld [vmem:[%s1963_s1 + $0x60] sm:$0xff]  ;;  %v1488_v17 = vld [vmem:[%s1963_s1 + $0x58] sm:$0xff]  ;;  %v34_v21 = vld [vmem:[%s1962_s0 + $0x30] sm:$0xff]  ;;  %46 = vst [vmem:[#allocation1 + $0x1] ss:$4 sm:$0xff] %v30_v19 }
   0x7   :  { %610 = vmatpush.bf16.msra.mxu1 %v1491_v5  ;;  %v1497_v14 = vld [vmem:[%s1963_s1 + $0xa0] sm:$0xff]  ;;  %v1496_v22 = vld [vmem:[%s1963_s1 + $0x98] sm:$0xff]  ;;  %50 = vst [vmem:[#allocation1 + $0x3] ss:$4 sm:$0xff] %v34_v21  ;;  %v1479_v24 = vld [vmem:[%s1963_s1 + $0x10] sm:$0xff] }
   0x8   :  { %623 = vmatpush.bf16.msra.mxu2 %v1499_v6  ;;  %v1505_v15 = vld [vmem:[%s1963_s1 + $0xe0] sm:$0xff]  ;;  %v1504_v23 = vld [vmem:[%s1963_s1 + $0xd8] sm:$0xff]  ;;  %v1487_v25 = vld [vmem:[%s1963_s1 + $0x50] sm:$0xff] }
   0x9   :  { %636 = vmatpush.bf16.msra.mxu3 %v1507_v7  ;;  %v28_v18 = vld [vmem:[%s1962_s0] sm:$0xff]  ;;  %v1495_v26 = vld [vmem:[%s1963_s1 + $0x90] sm:$0xff]  ;;  %v29_v28 = vld [vmem:[%s1962_s0 + $0x8] sm:$0xff] }
   0xa   :  { %598 = vmatpush.bf16.msra.mxu0 %v1482_v8  ;;  %v32_v20 = vld [vmem:[%s1962_s0 + $0x20] sm:$0xff]  ;;  %44 = vst [vmem:[#allocation1] ss:$4 sm:$0xff] %v28_v18  ;;  %v1503_v27 = vld [vmem:[%s1963_s1 + $0xd0] sm:$0xff]  ;;  %v31_v29 = vld [vmem:[%s1962_s0 + $0x18] sm:$0xff] }
   0xb   :  { %611 = vmatpush.bf16.msra.mxu1 %v1490_v9  ;;  %48 = vst [vmem:[#allocation1 + $0x2] ss:$4 sm:$0xff] %v32_v20  ;;  %v1478_v30 = vld [vmem:[%s1963_s1 + $0x8] sm:$0xff]  ;;  %v1477_v35 = vld [vmem:[%s1963_s1] sm:$0xff]  ;;  %v35_v36 = vld [vmem:[%s1962_s0 + $0x38] sm:$0xff] }
   0xc   :  { %624 = vmatpush.bf16.msra.mxu2 %v1498_v10  ;;  %v1486_v31 = vld [vmem:[%s1963_s1 + $0x48] sm:$0xff]  ;;  %52 = vst [vmem:[#allocation1 + $0x20] ss:$4 sm:$0xff] %v29_v28  ;;  %v1485_v37 = vld [vmem:[%s1963_s1 + $0x40] sm:$0xff]  ;;  %v1516_v40 = vld [vmem:[%s1963_s1 + $0x138] sm:$0xff] }
   0xd   :  { %637 = vmatpush.bf16.msra.mxu3 %v1506_v11  ;;  %v1494_v32 = vld [vmem:[%s1963_s1 + $0x88] sm:$0xff]  ;;  %54 = vst [vmem:[#allocation1 + $0x21] ss:$4 sm:$0xff] %v31_v29  ;;  %v1493_v38 = vld [vmem:[%s1963_s1 + $0x80] sm:$0xff]  ;;  %v1524_v42 = vld [vmem:[%s1963_s1 + $0x178] sm:$0xff] }
   0xe   :  { %599 = vmatpush.bf16.msra.mxu0 %v1481_v12  ;;  %v1502_v33 = vld [vmem:[%s1963_s1 + $0xc8] sm:$0xff]  ;;  %v1501_v39 = vld [vmem:[%s1963_s1 + $0xc0] sm:$0xff]  ;;  %58 = vst [vmem:[#allocation1 + $0x23] ss:$4 sm:$0xff] %v35_v36  ;;  %v1532_v46 = vld [vmem:[%s1963_s1 + $0x1b8] sm:$0xff] }
   0xf   :  { %612 = vmatpush.bf16.msra.mxu1 %v1489_v13  ;;  %v33_v34 = vld [vmem:[%s1962_s0 + $0x28] sm:$0xff]  ;;  %v1540_v47 = vld [vmem:[%s1963_s1 + $0x1f8] sm:$0xff]  ;;  %v1515_v52 = vld [vmem:[%s1963_s1 + $0x130] sm:$0xff] }
  0x10   :  { %625 = vmatpush.bf16.msra.mxu2 %v1497_v14  ;;  %56 = vst [vmem:[#allocation1 + $0x22] ss:$4 sm:$0xff] %v33_v34  ;;  %v1523_v53 = vld [vmem:[%s1963_s1 + $0x170] sm:$0xff]  ;;  %v1514_v56 = vld [vmem:[%s1963_s1 + $0x128] sm:$0xff]  ;;  %v1513_v60 = vld [vmem:[%s1963_s1 + $0x120] sm:$0xff] }
  0x11   :  { %638 = vmatpush.bf16.msra.mxu3 %v1505_v15  ;;  %v1531_v54 = vld [vmem:[%s1963_s1 + $0x1b0] sm:$0xff]  ;;  %v1522_v57 = vld [vmem:[%s1963_s1 + $0x168] sm:$0xff]  ;;  %v1521_v61 = vld [vmem:[%s1963_s1 + $0x160] sm:$0xff] }
  0x12   :  { %600 = vmatpush.bf16.msra.mxu0 %v1480_v16  ;;  %v61_v41 = vld.sshfl [vmem:[#allocation1 + $0x10] sm:$0xff pattern:$0x73625140]  ;;  %v59_v43 = vld.sshfl [vmem:[#allocation1] sm:$0xff pattern:$0x73625140] }
  0x13   :  { %613 = vmatpush.bf16.msra.mxu1 %v1488_v17  ;;  %v62_v44 = vld.sshfl [vmem:[#allocation1 + $0x18] sm:$0xff pattern:$0x73625140]  ;;  %v60_v45 = vld.sshfl [vmem:[#allocation1 + $0x8] sm:$0xff pattern:$0x73625140]  ;;  %v77_v48 = vpack.c.bf16 %v61_v41, %v61_v41  ;;  %v75_v49 = vpack.c.bf16 %v59_v43, %v59_v43 }
  0x14   :  { %626 = vmatpush.bf16.msra.mxu2 %v1496_v22  ;;  %v78_v50 = vpack.c.bf16 %v62_v44, %v62_v44  ;;  %v76_v51 = vpack.c.bf16 %v60_v45, %v60_v45  ;;  %v1539_v55 = vld [vmem:[%s1963_s1 + $0x1f0] sm:$0xff]  ;;  %v1530_v58 = vld [vmem:[%s1963_s1 + $0x1a8] sm:$0xff]  ;;  %v1529_v62 = vld [vmem:[%s1963_s1 + $0x1a0] sm:$0xff] }
  0x15   :  { %639 = vmatpush.bf16.msra.mxu3 %v1504_v23  ;;  %v1538_v59 = vld [vmem:[%s1963_s1 + $0x1e8] sm:$0xff]  ;;  %v1537_v63 = vld [vmem:[%s1963_s1 + $0x1e0] sm:$0xff]  ;;  %v1512_v0 = vld [vmem:[%s1963_s1 + $0x118] sm:$0xff] }
  0x16   :  { %601 = vmatpush.bf16.msra.mxu0 %v1479_v24  ;;  %v1520_v1 = vld [vmem:[%s1963_s1 + $0x158] sm:$0xff]  ;;  %v1511_v4 = vld [vmem:[%s1963_s1 + $0x110] sm:$0xff]  ;;  %v1510_v8 = vld [vmem:[%s1963_s1 + $0x108] sm:$0xff] }
  0x17   :  { %614 = vmatpush.bf16.msra.mxu1 %v1487_v25  ;;  %v1528_v2 = vld [vmem:[%s1963_s1 + $0x198] sm:$0xff]  ;;  %v1519_v5 = vld [vmem:[%s1963_s1 + $0x150] sm:$0xff]  ;;  %v1518_v9 = vld [vmem:[%s1963_s1 + $0x148] sm:$0xff] }
  0x18   :  { %627 = vmatpush.bf16.msra.mxu2 %v1495_v26  ;;  %v1536_v3 = vld [vmem:[%s1963_s1 + $0x1d8] sm:$0xff]  ;;  %v1527_v6 = vld [vmem:[%s1963_s1 + $0x190] sm:$0xff]  ;;  %v1526_v10 = vld [vmem:[%s1963_s1 + $0x188] sm:$0xff] }
  0x19   :  { %640 = vmatpush.bf16.msra.mxu3 %v1503_v27  ;;  %v1535_v7 = vld [vmem:[%s1963_s1 + $0x1d0] sm:$0xff]  ;;  %v1534_v11 = vld [vmem:[%s1963_s1 + $0x1c8] sm:$0xff]  ;;  %v1509_v12 = vld [vmem:[%s1963_s1 + $0x100] sm:$0xff] }
  0x1a   :  { %602 = vmatpush.bf16.msra.mxu0 %v1478_v30  ;;  %v1517_v13 = vld [vmem:[%s1963_s1 + $0x140] sm:$0xff]  ;;  %v64_v17 = vld.sshfl [vmem:[#allocation1 + $0x28] sm:$0xff pattern:$0x73625140]  ;;  %v704_v24 = vld [vmem:[%s1964_s2 + $0x18] sm:$0xff] }
  0x1b   :  { %615 = vmatpush.bf16.msra.mxu1 %v1486_v31  ;;  %v1525_v14 = vld [vmem:[%s1963_s1 + $0x180] sm:$0xff]  ;;  %v65_v18 = vld.sshfl [vmem:[#allocation1 + $0x30] sm:$0xff pattern:$0x73625140]  ;;  %v80_v21 = vpack.c.bf16 %v64_v17, %v64_v17  ;;  %v702_v27 = vld [vmem:[%s1964_s2 + $0x8] sm:$0xff] }
  0x1c   :  { %628 = vmatpush.bf16.msra.mxu2 %v1494_v32  ;;  %v1533_v15 = vld [vmem:[%s1963_s1 + $0x1c0] sm:$0xff]  ;;  %v66_v19 = vld.sshfl [vmem:[#allocation1 + $0x38] sm:$0xff pattern:$0x73625140]  ;;  %v81_v22 = vpack.c.bf16 %v65_v18, %v65_v18  ;;  %v703_v26 = vld [vmem:[%s1964_s2 + $0x10] sm:$0xff] }
  0x1d   :  { %641 = vmatpush.bf16.msra.mxu3 %v1502_v33  ;;  %v63_v16 = vld.sshfl [vmem:[#allocation1 + $0x20] sm:$0xff pattern:$0x73625140]  ;;  %v82_v23 = vpack.c.bf16 %v66_v19, %v66_v19  ;;  %v1590_v17 = vmov 2475754826  }
  0x1e   :  { %603 = vmatpush.bf16.msra.mxu0 %v1477_v35  ;;  %v79_v20 = vpack.c.bf16 %v63_v16, %v63_v16  ;;  %v701_v33 = vld [vmem:[%s1964_s2] sm:$0xff]  ;;  %v732_v35 = vld [vmem:[%s1965_s3 + $0x8] sm:$0xff] }
  0x1f   :  { %616 = vmatpush.bf16.msra.mxu1 %v1485_v37  ;;  %v1871_v34 = vld [vmem:[%s1968_s6] sm:$0xf] }
  0x20   :  { %629 = vmatpush.bf16.msra.mxu2 %v1493_v38  ;;  %v731_v36 = vld [vmem:[%s1965_s3] sm:$0xff]  ;;  %v211_v37 = vperm.slane %v1871_v34, 0 }
  0x21   :  { %642 = vmatpush.bf16.msra.mxu3 %v1501_v39  ;;  %604 = vmatmul.bf16.vlgmr.msra.gmra.mxu0 %v75_v49 }
  0x22   :  { %648 = vmatpush.bf16.msrb.mxu0 %v1516_v40  ;;  %617 = vmatmul.bf16.vlgmr.msra.gmra.mxu1 %v76_v51 }
  0x23   :  { %661 = vmatpush.bf16.msrb.mxu1 %v1524_v42  ;;  %630 = vmatmul.bf16.vlgmr.msra.gmra.mxu2 %v77_v48 }
  0x24   :  { %674 = vmatpush.bf16.msrb.mxu2 %v1532_v46  ;;  %643 = vmatmul.bf16.vlgmr.msra.gmra.mxu3 %v78_v50 }
  0x25   :  { %687 = vmatpush.bf16.msrb.mxu3 %v1540_v47 }
  0x26   :  { %649 = vmatpush.bf16.msrb.mxu0 %v1515_v52 }
  0x27   :  { %662 = vmatpush.bf16.msrb.mxu1 %v1523_v53 }
  0x28   :  { %675 = vmatpush.bf16.msrb.mxu2 %v1531_v54 }
  0x29   :  { %688 = vmatpush.bf16.msrb.mxu3 %v1539_v55 }
  0x2a   :  { %650 = vmatpush.bf16.msrb.mxu0 %v1514_v56 }
  0x2b   :  { %663 = vmatpush.bf16.msrb.mxu1 %v1522_v57  ;;  %v705_v57 = vperm.slane %v1871_v34, 1 }
  0x2c   :  { %676 = vmatpush.bf16.msrb.mxu2 %v1530_v58 }
  0x2d   :  { %689 = vmatpush.bf16.msrb.mxu3 %v1538_v59 }
  0x2e   :  { %651 = vmatpush.bf16.msrb.mxu0 %v1513_v60 }
  0x2f   :  { %664 = vmatpush.bf16.msrb.mxu1 %v1521_v61  ;;  %v1586_v61 = vmov 2  }
  0x30   :  { %677 = vmatpush.bf16.msrb.mxu2 %v1529_v62  ;;  %1557 = vset.pattern.permute.xlu2 %v1586_v61  ;;  %v1587_v62 = vmov 1  }
  0x31   :  { %690 = vmatpush.bf16.msrb.mxu3 %v1537_v63  ;;  %1556 = vset.pattern.permute.xlu1 %v1587_v62  ;;  %v1588_v63 = vmov 0  }
  0x32   :  { %652 = vmatpush.bf16.msrb.mxu0 %v1512_v0  ;;  %1555 = vset.pattern.permute.xlu0 %v1588_v63  ;;  %v733_v0 = vperm.slane %v1871_v34, 2 }
  0x33   :  { %665 = vmatpush.bf16.msrb.mxu1 %v1520_v1 }
  0x34   :  { %678 = vmatpush.bf16.msrb.mxu2 %v1528_v2 }
  0x35   :  { %691 = vmatpush.bf16.msrb.mxu3 %v1536_v3 }
  0x36   :  { %653 = vmatpush.bf16.msrb.mxu0 %v1511_v4 }
  0x37   :  { %666 = vmatpush.bf16.msrb.mxu1 %v1519_v5 }
  0x38   :  { %679 = vmatpush.bf16.msrb.mxu2 %v1527_v6 }
  0x39   :  { %692 = vmatpush.bf16.msrb.mxu3 %v1535_v7 }
  0x3a   :  { %654 = vmatpush.bf16.msrb.mxu0 %v1510_v8 }
  0x3b   :  { %667 = vmatpush.bf16.msrb.mxu1 %v1518_v9 }
  0x3c   :  { %680 = vmatpush.bf16.msrb.mxu2 %v1526_v10 }
  0x3d   :  { %693 = vmatpush.bf16.msrb.mxu3 %v1534_v11 }
  0x3e   :  { %655 = vmatpush.bf16.msrb.mxu0 %v1509_v12 }
  0x3f   :  { %668 = vmatpush.bf16.msrb.mxu1 %v1517_v13 }
  0x40   :  { %681 = vmatpush.bf16.msrb.mxu2 %v1525_v14 }
  0x41   :  { %694 = vmatpush.bf16.msrb.mxu3 %v1533_v15  ;;  %656 = vmatmul.bf16.vlgmr.msrb.gmra.mxu0 %v79_v20  ;;  %v1589_v15 = vmov 683565275   ;;  %v1591_v20 = vmov 2131351028  }
  0x42   :  { %669 = vmatmul.bf16.vlgmr.msrb.gmra.mxu1 %v80_v21  ;;  %722 = vmatpush.msra.mxu0 %v704_v24 }
  0x43   :  { %682 = vmatmul.bf16.vlgmr.msrb.gmra.mxu2 %v81_v22  ;;  %752 = vmatpush.msra.mxu1 %v732_v35 }
  0x44   :  { %695 = vmatmul.bf16.vlgmr.msrb.gmra.mxu3 %v82_v23  ;;  %723 = vmatpush.msra.mxu0 %v703_v26  ;;  %v1592_v23 = vmov 2102212464   ;;  %v1593_v26 = vmov 920167782  }
  0x45   :  { %753 = vmatpush.msra.mxu1 %v731_v36 }
  0x46   :  { %724 = vmatpush.msra.mxu0 %v702_v27 }
  0x48   :  { %725 = vmatpush.msra.mxu0 %v701_v33 }
  0x9e   :  { %v605_v25 = vpop.f32.mrf.mxu0 }
  0x9f   :  { %v618_v28 = vpop.f32.mrf.mxu1  ;;  %v606_v40 = vadd.f32 %v605_v25, %v211_v37 }
  0xa1   :  { %v619_v41 = vadd.f32 %v618_v28, %v606_v40 }
  0xa6   :  { %v631_v29 = vpop.f32.mrf.mxu2  ;;  %v607_v31 = vpop.f32.mrf.mxu0 }
  0xa7   :  { %v644_v30 = vpop.f32.mrf.mxu3  ;;  %v620_v32 = vpop.f32.mrf.mxu1  ;;  %v632_v42 = vadd.f32 %v631_v29, %v619_v41  ;;  %v1594_v29 = vmov 1326507024  }
  0xa9   :  { %v645_v43 = vadd.f32 %v644_v30, %v632_v42 }
  0xae   :  { %v633_v38 = vpop.f32.mrf.mxu2 }
  0xaf   :  { %v646_v39 = vpop.f32.mrf.mxu3 }
  0xbe   :  { %v657_v44 = vpop.f32.mrf.mxu0 }
  0xbf   :  { %v670_v45 = vpop.f32.mrf.mxu1  ;;  %v658_v46 = vadd.f32 %v657_v44, %v645_v43 }
  0xc1   :  { %v671_v47 = vadd.f32 %v670_v45, %v658_v46 }
  0xc6   :  { %v683_v48 = vpop.f32.mrf.mxu2  ;;  %v659_v51 = vpop.f32.mrf.mxu0 }
  0xc7   :  { %v696_v49 = vpop.f32.mrf.mxu3  ;;  %v684_v50 = vadd.f32 %v683_v48, %v671_v47  ;;  %v672_v52 = vpop.f32.mrf.mxu1 }
  0xc9   :  { %v697_v53 = vadd.f32 %v696_v49, %v684_v50 }
  0xcb   :  { %v700_v54 = vmax.f32 %v697_v53, 0.0 }
  0xcd   :  { %1467 = vmatmul.msk.f32.vlgmr.msra.gmra.mxu0 %vm706_vm0, %v700_v54 }
  0xce   :  { %v685_v55 = vpop.f32.mrf.mxu2 }
  0xcf   :  { %v698_v56 = vpop.f32.mrf.mxu3 }
 0x14a   :  { %v727_v58 = vpop.f32.mrf.mxu0 }
 0x14b   :  { %v728_v59 = vadd.f32 %v727_v58, %v705_v57 }
 0x14d   :  { %v730_v60 = vmax.f32 %v728_v59, 0.0 }
 0x14f   :  { %1468 = vmatmul.msk.f32.vlgmr.msra.gmra.mxu1 %vm734_vm1, %v730_v60 }
 0x1cc   :  { %v755_v1 = vpop.f32.mrf.mxu1 }
 0x1cd   :  { %v756_v2 = vadd.f32 %v755_v1, %v733_v0 }
 0x1cf   :  { %v1884_v3 = vmul.f32 0.5, %v756_v2 }
 0x1d1   :  { %v762_v4 = vand.u32 2139095040, %v1884_v3  ;;  %v759_v7 = vand.u32 2147483647, %v1884_v3  ;;  %vm761_vm14 = vcmp.lt.s32.totalorder %v1884_v3, 0 }
 0x1d3   :  { %v763_v5 = vshrl.u32 %v762_v4, 23  ;;  %v766_v9 = vand.u32 8388607, %v759_v7  ;;  %vm760_vm15 = vcmp.le.f32.partialorder %v759_v7, 0.7853982 }
 0x1d5   :  { %v1469_v6 = vadd.s32 4294967169, %v763_v5  ;;  %v767_v13 = vor.u32 8388608, %v766_v9 }
 0x1d7   :  { %v769_v8 = vadd.s32 1, %v1469_v6  ;;  %v1900_v35 = vshll.u32 %v767_v13, 8 }
 0x1d9   :  { %vm770_vm2 = vcmp.gt.s32.totalorder %v769_v8, 0  ;;  %v808_v44 = vand.u32 65535, %v1900_v35  ;;  %v809_v45 = vshrl.u32 %v1900_v35, 16 }
 0x1da   :  { %v771_v10 = vsel %vm770_vm2, %v769_v8, 0 }
 0x1db   :  { %v773_v11 = vand.u32 31, %v771_v10  ;;  %v1892_v14 = vshrl.u32 %v771_v10, 5 }
 0x1dd   :  { %v1890_v12 = vsub.s32 32, %v773_v11  ;;  %v776_v16 = vshll.u32 %v1589_v15, %v773_v11  ;;  %v779_v18 = vshll.u32 %v1590_v17, %v773_v11  ;;  %v782_v22 = vshll.u32 %v1591_v20, %v773_v11 }
 0x1de   :  { %v785_v25 = vshll.u32 %v1592_v23, %v773_v11  ;;  %v788_v28 = vshll.u32 %v1593_v26, %v773_v11  ;;  %vm791_vm3 = vcmp.lt.s32.totalorder %v1892_v14, 1  ;;  %vm794_vm4 = vcmp.lt.s32.totalorder %v1892_v14, 4 }
 0x1df   :  { %v777_v19 = vshrl.u32 %v1590_v17, %v1890_v12  ;;  %v780_v21 = vshrl.u32 %v1591_v20, %v1890_v12  ;;  %v783_v24 = vshrl.u32 %v1592_v23, %v1890_v12  ;;  %v786_v27 = vshrl.u32 %v1593_v26, %v1890_v12 }
 0x1e0   :  { %v789_v30 = vshrl.u32 %v1594_v29, %v1890_v12  ;;  %vm793_vm5 = vcmp.lt.s32.totalorder %v1892_v14, 3  ;;  %vm792_vm6 = vcmp.lt.s32.totalorder %v1892_v14, 2  ;;  %v775_v11 = vshrl.u32 %v1589_v15, %v1890_v12 }
 0x1e1   :  { %v778_v31 = vor.u32 %v777_v19, %v776_v16  ;;  %v781_v32 = vor.u32 %v780_v21, %v779_v18  ;;  %v784_v33 = vor.u32 %v783_v24, %v782_v22  ;;  %v787_v36 = vor.u32 %v786_v27, %v785_v25 }
 0x1e2   :  { %v790_v37 = vor.u32 %v789_v30, %v788_v28 }
 0x1e3   :  { %v799_v38 = vsel %vm791_vm3, %v778_v31, %v781_v32  ;;  %v803_v39 = vsel %vm791_vm3, %v781_v32, %v784_v33  ;;  %v800_v40 = vsel %vm794_vm4, %v787_v36, 920167782  ;;  %v796_v8 = vsel %vm794_vm4, %v784_v33, 2102212464 }
 0x1e4   :  { %v804_v41 = vsel %vm794_vm4, %v790_v37, 1326507024  ;;  %v801_v42 = vsel %vm793_vm5, %v784_v33, %v800_v40  ;;  %v795_v20 = vsel %vm791_vm3, %v775_v11, %v778_v31  ;;  %v797_v21 = vsel %vm793_vm5, %v781_v32, %v796_v8 }
 0x1e5   :  { %v805_v43 = vsel %vm793_vm5, %v787_v36, %v804_v41  ;;  %v802_v46 = vsel %vm792_vm6, %v799_v38, %v801_v42  ;;  %v798_v12 = vsel %vm792_vm6, %v795_v20, %v797_v21  ;;  %vm902_vm4 = vweird.f32 %v1884_v3 }
 0x1e6   :  { %v806_v47 = vsel %vm792_vm6, %v803_v39, %v805_v43  ;;  %v832_v50 = vand.u32 65535, %v802_v46  ;;  %v833_v51 = vshrl.u32 %v802_v46, 16  ;;  %v852_v28 = vmul.u32 %v1900_v35, %v798_v12 }
 0x1e7   :  { %v810_v48 = vand.u32 65535, %v806_v47  ;;  %v811_v49 = vshrl.u32 %v806_v47, 16  ;;  %v1068_v12 = vlaneseq }
 0x1e8   :  { %v835_v54 = vmul.u32 %v833_v51, %v808_v44  ;;  %v836_v55 = vmul.u32 %v832_v50, %v809_v45  ;;  %v834_v59 = vmul.u32 %v832_v50, %v808_v44  ;;  %v837_v0 = vmul.u32 %v833_v51, %v809_v45 }
 0x1e9   :  { %v813_v52 = vmul.u32 %v811_v49, %v808_v44  ;;  %v814_v53 = vmul.u32 %v810_v48, %v809_v45  ;;  %v812_v56 = vmul.u32 %v810_v48, %v808_v44  ;;  %v815_v58 = vmul.u32 %v811_v49, %v809_v45 }
 0x1ea   :  { %v838_v60 = vshll.u32 %v835_v54, 16  ;;  %v840_v2 = vshll.u32 %v836_v55, 16  ;;  %v839_v18 = vshrl.u32 %v835_v54, 16  ;;  %v841_v24 = vshrl.u32 %v836_v55, 16 }
 0x1eb   :  { %v816_v57 = vshll.u32 %v813_v52, 16  ;;  %v818_v61 = vshll.u32 %v814_v53, 16  ;;  %v817_v13 = vshrl.u32 %v813_v52, 16  ;;  %v819_v22 = vshrl.u32 %v814_v53, 16 }
 0x1ec   :  { %vm842_vm8 = vc.u32 %v834_v59, %v838_v60  ;;  %v844_v4 = vadd.s32 %v838_v60, %v834_v59 }
 0x1ed   :  { %vm820_vm7 = vc.u32 %v812_v56, %v816_v57  ;;  %v822_v62 = vadd.s32 %v816_v57, %v812_v56  ;;  %v843_v6 = vsel %vm842_vm8, 1, %v1588_v63  ;;  %vm1191_vm8 = vcmask 23552  }
 0x1ee   :  { %v821_v1 = vsel %vm820_vm7, 1, %v1588_v63  ;;  %v845_v10 = vadd.s32 %v843_v6, %v837_v0  ;;  %vm846_vm10 = vc.u32 %v844_v4, %v840_v2  ;;  %v848_v27 = vadd.s32 %v844_v4, %v840_v2 }
 0x1ef   :  { %v823_v5 = vadd.s32 %v821_v1, %v815_v58  ;;  %vm824_vm9 = vc.u32 %v822_v62, %v818_v61  ;;  %v847_v17 = vsel %vm846_vm10, 1, %v1588_v63 }
 0x1f0   :  { %v825_v9 = vsel %vm824_vm9, 1, %v1588_v63  ;;  %v849_v19 = vadd.s32 %v847_v17, %v845_v10 }
 0x1f1   :  { %v827_v16 = vadd.s32 %v825_v9, %v823_v5 }
 0x1f2   :  { %v850_v25 = vadd.s32 %v849_v19, %v839_v18 }
 0x1f3   :  { %v828_v23 = vadd.s32 %v827_v16, %v817_v13 }
 0x1f4   :  { %v851_v15 = vadd.s32 %v850_v25, %v841_v24 }
 0x1f5   :  { %v829_v26 = vadd.s32 %v828_v23, %v819_v22 }
 0x1f6   :  { %v855_v63 = vadd.s32 1, %v851_v15 }
 0x1f7   :  { %vm854_vm11 = vc.u32 %v829_v26, %v848_v27  ;;  %v853_v14 = vadd.s32 %v848_v27, %v829_v26  ;;  %v1595_v26 = vmov 3   ;;  %v1134_v27 = vld [vmem:[%s1966_s4] sm:$0xff] }
 0x1f8   :  { %v856_v29 = vsel %vm854_vm11, %v855_v63, %v851_v15  ;;  %v1069_v15 = vand.u32 127, %v1068_v12 }
 0x1f9   :  { %v857_v30 = vadd.s32 %v856_v29, %v852_v28 }
 0x1fa   :  { %v1073_v63 = vshra.s32 %v1069_v15, 2  ;;  %v1070_v28 = vshra.s32 %v1069_v15, 3 }
 0x1fb   :  { %v858_v31 = vadd.s32 536870912, %v857_v30 }
 0x1fc   :  { %v1074_v29 = vand.u32 1, %v1073_v63 }
 0x1fd   :  { %v859_v33 = vshrl.u32 %v858_v31, 30 }
 0x1ff   :  { %v860_v36 = vshll.u32 %v859_v33, 30  ;;  %v883_v58 = vsub.s32 4, %v859_v33 }
 0x201   :  { %v861_v32 = vsub.s32 %v857_v30, %v860_v36  ;;  %v884_v0 = vsel %vm761_vm14, %v883_v58, %v859_v33  ;;  %v1071_v30 = vand.u32 1, %v1070_v28  ;;  %v1076_v33 = vshra.s32 %v1069_v15, 1 }
 0x202   :  { %v886_v4 = vsel %vm760_vm15, 0, %v884_v0 }
 0x203   :  { %vm862_vm12 = vcmp.lt.s32.totalorder %v861_v32, 0  ;;  %v863_v37 = vsub.s32 0, %v861_v32  ;;  %v903_v7 = vand.u32 3, %v886_v4  ;;  %v1057_v10 = vadd.s32 3, %v886_v4  ;;  %v1165_v4 = vld [vmem:[%s1967_s5] sm:$0xff] }
 0x205   :  { %v864_v38 = vsel %vm862_vm12, %v863_v37, %v861_v32  ;;  %vm905_vm0 = vcmp.eq.s32.totalorder %v903_v7, 0  ;;  %vm908_vm2 = vcmp.eq.s32.totalorder %v903_v7, 2  ;;  %v1058_v17 = vand.u32 3, %v1057_v10 }
 0x206   :  { %v865_v39 = vclz %v864_v38  ;;  %vm904_vm3 = vcmp.lt.s32.totalorder %v903_v7, 2  ;;  %v1075_v37 = vcvt.s32.f32 %v1074_v29  ;;  %v1072_v38 = vcvt.s32.f32 %v1071_v30 }
 0x207   :  { %vm1060_vm5 = vcmp.eq.s32.totalorder %v1058_v17, 0  ;;  %vm1063_vm6 = vcmp.eq.s32.totalorder %v1058_v17, 2  ;;  %vm1059_vm7 = vcmp.lt.s32.totalorder %v1058_v17, 2  ;;  %v1167_v7 = vperm.slane %v1871_v34, 3 }
 0x208   :  { %v1470_v40 = vadd.s32 4294967294, %v865_v39  ;;  %v1077_v39 = vand.u32 1, %v1076_v33 }
 0x20a   :  { %vm1471_vm13 = vcmp.lt.s32.totalorder %v1470_v40, 0 }
 0x20b   :  { %v868_v41 = vsel %vm1471_vm13, 0, %v1470_v40  ;;  %v1082_v40 = vsub.f32 1.0, %v1075_v37 }
 0x20c   :  { %v869_v42 = vsub.s32 32, %v868_v41  ;;  %v873_v43 = vsub.s32 4294967266, %v868_v41  ;;  %v870_v44 = vshll.u32 %v861_v32, %v868_v41  ;;  %v1081_v41 = vsub.f32 1.0, %v1072_v38 }
 0x20e   :  { %v871_v45 = vshrl.u32 %v853_v14, %v869_v42  ;;  %v874_v46 = vadd.s32 127, %v873_v43  ;;  %v1079_v14 = vand.u32 1, %v1069_v15  ;;  %v1078_v43 = vcvt.s32.f32 %v1077_v39 }
 0x210   :  { %v872_v35 = vor.u32 %v871_v45, %v870_v44  ;;  %v875_v47 = vshll.u32 %v874_v46, 23 }
 0x212   :  { %v876_v48 = vor.u32 4788187, %v875_v47  ;;  %v879_v50 = vcvt.s32.f32 %v872_v35 }
 0x214   :  { %v877_v49 = vand.u32 2147483647, %v876_v48  ;;  %v1080_v48 = vcvt.s32.f32 %v1079_v14 }
 0x216   :  { %v880_v51 = vmul.f32 %v879_v50, %v877_v49  ;;  %v1083_v50 = vsub.f32 1.0, %v1078_v43 }
 0x218   :  { %v881_v52 = vxor.u32 2147483648, %v880_v51 }
 0x21a   :  { %v882_v53 = vsel %vm761_vm14, %v881_v52, %v880_v51 }
 0x21b   :  { %v885_v54 = vsel %vm760_vm15, %v1884_v3, %v882_v53  ;;  %v1135_v3 = vld [vmem:[%s1966_s4 + $0x8] sm:$0xff] }
 0x21c   :  { %v887_v55 = vmul.f32 %v885_v54, %v885_v54  ;;  %1153 = vmatpush.msra.mxu2 %v1135_v3 }
 0x21e   :  { %v888_v56 = vmul.f32 -0.001358992, %v887_v55  ;;  %v895_v57 = vmul.f32 -0.00019511016, %v887_v55  ;;  %1154 = vmatpush.msra.mxu2 %v1134_v27 }
 0x220   :  { %v889_v59 = vadd.f32 0.041655596, %v888_v56  ;;  %v896_v60 = vadd.f32 0.008332121, %v895_v57 }
 0x222   :  { %v890_v61 = vmul.f32 %v889_v59, %v887_v55  ;;  %v897_v62 = vmul.f32 %v896_v60, %v887_v55 }
 0x224   :  { %v891_v1 = vadd.f32 -0.4999988, %v890_v61  ;;  %v898_v2 = vadd.f32 -0.16666654, %v897_v62 }
 0x226   :  { %v892_v5 = vmul.f32 %v891_v1, %v887_v55  ;;  %v899_v6 = vmul.f32 %v898_v2, %v887_v55  ;;  %v1166_v2 = vld [vmem:[%s1967_s5 + $0x8] sm:$0xff] }
 0x227   :  { %1185 = vmatpush.msra.mxu3 %v1166_v2 }
 0x228   :  { %v893_v8 = vadd.f32 1.0, %v892_v5  ;;  %v900_v9 = vadd.f32 1.0, %v899_v6 }
 0x229   :  { %1186 = vmatpush.msra.mxu3 %v1165_v4 }
 0x22a   :  { %v901_v11 = vmul.f32 %v900_v9, %v885_v54  ;;  %v909_v13 = vxor.u32 2147483648, %v893_v8  ;;  %v1084_v54 = vsub.f32 1.0, %v1080_v48 }
 0x22c   :  { %v906_v16 = vxor.u32 2147483648, %v901_v11  ;;  %v910_v19 = vsel %vm908_vm2, %v909_v13, %v901_v11  ;;  %v1065_v23 = vsel %vm1063_vm6, %v909_v13, %v901_v11 }
 0x22e   :  { %v907_v18 = vsel %vm905_vm0, %v893_v8, %v906_v16  ;;  %v1062_v22 = vsel %vm1060_vm5, %v893_v8, %v906_v16 }
 0x22f   :  { %v911_v20 = vsel %vm904_vm3, %v907_v18, %v910_v19  ;;  %v1066_v24 = vsel %vm1059_vm7, %v1062_v22, %v1065_v23 }
 0x230   :  { %v912_v21 = vsel %vm902_vm4, nan, %v911_v20  ;;  %v1067_v25 = vsel %vm902_vm4, nan, %v1066_v24 }
 0x231   :  { %1111 = vperm.xlu2 %1557, %v912_v21   ;;  %1099 = vperm.xlu1 %1556, %v912_v21  }
 0x232   :  { %1087 = vperm.xlu0 %1555, %v912_v21  }
 0x239   :  { %1116 = vperm.xlu2 %1557, %v1067_v25   ;;  %1104 = vperm.xlu1 %1556, %v1067_v25  }
 0x23a   :  { %1093 = vperm.xlu0 %1555, %v1067_v25  }
 0x241   :  { %1559 = vset.pattern.permute.xlu1 %v1595_v26 }
 0x242   :  { %1558 = vset.pattern.permute.xlu0 %v1595_v26  ;;  %1128 = vperm.xlu1 %1559, %v1067_v25  }
 0x243   :  { %1123 = vperm.xlu0 %1558, %v912_v21  }
 0x28b   :  { %v1112_v32 = vpop.permute.xlu2 %1111 }
 0x28c   :  { %v1114_v55 = vmul.f32 %v1112_v32, %v1083_v50 }
 0x293   :  { %v1117_v49 = vpop.permute.xlu2 %1116 }
 0x294   :  { %v1119_v53 = vmul.f32 %v1117_v49, %v1078_v43 }
 0x296   :  { %v1120_v60 = vadd.f32 %v1119_v53, %v1114_v55 }
 0x2a3   :  { %v1100_v31 = vpop.permute.xlu1 %1099 }
 0x2a4   :  { %v1088_v36 = vpop.permute.xlu0 %1087  ;;  %v1102_v35 = vmul.f32 %v1100_v31, %v1082_v40 }
 0x2a5   :  { %v1090_v47 = vmul.f32 %v1088_v36, %v1081_v41 }
 0x2ab   :  { %v1105_v42 = vpop.permute.xlu1 %1104 }
 0x2ac   :  { %v1107_v44 = vmul.f32 %v1105_v42, %v1075_v37  ;;  %v1094_v45 = vpop.permute.xlu0 %1093 }
 0x2ad   :  { %v1096_v46 = vmul.f32 %v1094_v45, %v1072_v38 }
 0x2ae   :  { %v1108_v51 = vadd.f32 %v1107_v44, %v1102_v35 }
 0x2af   :  { %v1097_v52 = vadd.f32 %v1096_v46, %v1090_v47 }
 0x2b1   :  { %v1109_v56 = vmul.f32 %v1108_v51, %v1097_v52 }
 0x2b3   :  { %v1121_v62 = vmul.f32 %v1120_v60, %v1109_v56 }
 0x2b4   :  { %v1129_v57 = vpop.permute.xlu1 %1128 }
 0x2b5   :  { %v1131_v58 = vmul.f32 %v1129_v57, %v1080_v48  ;;  %v1124_v59 = vpop.permute.xlu0 %1123 }
 0x2b6   :  { %v1126_v61 = vmul.f32 %v1124_v59, %v1084_v54 }
 0x2b8   :  { %v1132_v0 = vadd.f32 %v1131_v58, %v1126_v61 }
 0x2ba   :  { %v1133_v1 = vmul.f32 %v1132_v0, %v1121_v62 }
 0x2bc   :  { %1475 = vmatmul.msk.f32.vlgmr.msra.gmra.mxu2 %vm734_vm1, %v1133_v1 }
 0x33f   :  { %v1156_v5 = vpop.f32.mrf.mxu2 }
 0x340   :  { %v1159_v6 = vmul.f32 %v1156_v5, %v1156_v5 }
 0x342   :  { %1161 = vrot.lane.b32.xlu2 %v1159_v6, %s1596_s20 }
 0x39c   :  { %v1162_v8 = vpop.permute.xlu2 %1161 }
 0x39d   :  { %v1164_v9 = vadd.f32 %v1162_v8, %v1159_v6 }
 0x39f   :  { %1476 = vmatmul.msk.f32.vlgmr.msra.gmra.mxu3 %vm734_vm1, %v1164_v9 }
 0x422   :  { %v1188_v10 = vpop.f32.mrf.mxu3 }
 0x423   :  { %v1189_v11 = vadd.f32 %v1188_v10, %v1167_v7 }
 0x425   :  { %1192 = vst.msk [vmem:[#allocation2] sm:$0xff] %vm1191_vm8, %v1189_v11 }
 0x426   :  { %1196 = vsyncadd [#allocation3], 96  ;;  %s1199_s5 = sshll.u32 %s1969_s7, 4  ;;  %s1597_s23 = smov [#allocation2]   ;;  %s1200_s5 = int_to_ptr.hbm [resolvable:$true] %s1199_s5 }
 0x427   :  { %s1197_s24 = sshll.u32 %s1597_s23, 4  ;;  %s1598_s25 = smov 32   ;;  %s1198_s24 = int_to_ptr.vmem [resolvable:$true] %s1197_s24 }
 0x428   :  { %s1599_s26 = smov 2  }
 0x429   :  { %1205 = dma.vmem_to_hbm [thread:$0]  %s1198_s24, 32, %s1200_s5, [#allocation3], %s1598_s25, %s1598_s25, %s1599_s26  }
 0x42a   :  { %1584 = dma.done.wait [#allocation3], 128  }
 0x42b   :  { %1585 = vsyncadd [#allocation3], 4294967168 }
 0x42c   :  { %1210 = vsyncpa [#allocation3], 1 }

</bundles_post_ra>
